<compile_context>
chip_gen: v6e
topology: v6e:2x2x1
jax: 0.10.0
libtpu: 0.0.40
codegen_flags: <defaults>
</compile_context>

<pallas_src>
import functools

import jax
import jax.numpy as jnp
from jax.experimental import pallas as pl
from jax.experimental.pallas import tpu as pltpu

BN_EPS = 1e-5
_MiB = 1024 * 1024


def _round_up(n: int, m: int) -> int:
    return ((n + m - 1) // m) * m


def _round_down(n: int, m: int) -> int:
    return (n // m) * m


def _cdiv(a: int, b: int) -> int:
    return -(-a // b)


def _vmem_budgets():
    """(vmem_limit_bytes, tile-sizing budget) chosen per chip generation."""
    phys = 64 * _MiB  # v7x-safe default (64 MiB physical per TensorCore)
    try:
        phys = int(pltpu.get_tpu_info().vmem_capacity_bytes)
    except Exception:
        pass
    if phys >= 96 * _MiB:          # v5e / v6e: 128 MiB physical
        return 100 * _MiB, 64 * _MiB
    return 48 * _MiB, 24 * _MiB    # v7x


# ---------------------------------------------------------------------------
# Pass 1: per-core partial batch statistics (sum, sum-of-squares)
# ---------------------------------------------------------------------------
def _stats_kernel(x_ref, w1_ref, *rest, n_valid: int, tile_b: int,
                  nb_inner: int, stash_h: bool):
    if stash_h:
        h_out_ref, psum_ref, psumsq_ref, sum_ref, sumsq_ref = rest
    else:
        psum_ref, psumsq_ref, sum_ref, sumsq_ref = rest

    c = pl.program_id(0)   # core-split axis ("parallel", megacore on v7x)
    i = pl.program_id(1)   # batch-tile axis ("arbitrary", accumulated)

    @pl.when(i == 0)
    def _init():
        sum_ref[...] = jnp.zeros_like(sum_ref)
        sumsq_ref[...] = jnp.zeros_like(sumsq_ref)

    # Linear 1 without bias (training-mode BN's mean subtraction cancels b1).
    # bf16 operands on the MXU, f32 accumulation.
    h = jnp.dot(x_ref[...].astype(w1_ref.dtype), w1_ref[...],
                preferred_element_type=jnp.float32)

    if stash_h:
        h_out_ref[...] = h.astype(h_out_ref.dtype)

    # Row-validity mask (handles batch padding) doubles as the reduction
    # vector, so the cross-sublane reduction runs on the MXU, not the XLU.
    rows = (c * nb_inner + i) * tile_b + jax.lax.broadcasted_iota(
        jnp.int32, (1, tile_b), 1)
    ones = (rows < n_valid).astype(jnp.float32)               # (1, tile_b)
    sum_ref[...] += jnp.dot(ones, h, preferred_element_type=jnp.float32)
    sumsq_ref[...] += jnp.dot(ones, h * h, preferred_element_type=jnp.float32)

    @pl.when(i == nb_inner - 1)
    def _flush():
        # Per-core partials; (1, 8, H) blocks keep the sublane dim at 8.
        psum_ref[...] = jnp.broadcast_to(sum_ref[...][None], psum_ref.shape)
        psumsq_ref[...] = jnp.broadcast_to(sumsq_ref[...][None],
                                           psumsq_ref.shape)


# ---------------------------------------------------------------------------
# Pass 2: normalize + ReLU + Linear 2 (lane-dense output)
# ---------------------------------------------------------------------------
def _apply_from_x_kernel(x_ref, w1_ref, scale_ref, shift_ref, w2_ref, b2_ref,
                         o_ref):
    h = jnp.dot(x_ref[...].astype(w1_ref.dtype), w1_ref[...],
                preferred_element_type=jnp.float32)
    r = jnp.maximum(h * scale_ref[...] + shift_ref[...], 0.0)
    out = jnp.dot(r.astype(w2_ref.dtype), w2_ref[...],
                  preferred_element_type=jnp.float32) + b2_ref[...]
    o_ref[...] = out.astype(o_ref.dtype)


def _apply_from_h_kernel(h_ref, scale_ref, shift_ref, w2_ref, b2_ref, o_ref):
    r = jnp.maximum(h_ref[...].astype(jnp.float32) * scale_ref[...]
                    + shift_ref[...], 0.0)
    out = jnp.dot(r.astype(w2_ref.dtype), w2_ref[...],
                  preferred_element_type=jnp.float32) + b2_ref[...]
    o_ref[...] = out.astype(o_ref.dtype)


# ---------------------------------------------------------------------------
# One-time parameter preprocessing (hoisted out of the hot path)
# ---------------------------------------------------------------------------
def prepare_params(w1, b1, gamma, beta, w2, b2, *,
                   compute_dtype=jnp.bfloat16):
    """w1: (H, Din), w2: (Dout, H) in PyTorch Linear layout.

    b1 is accepted for API parity but dropped: BatchNorm (training mode)
    subtracts the batch mean, which cancels the Linear-1 bias exactly.
    Weights are stored in `compute_dtype` (bf16 by default -> native MXU),
    zero-padded so H and Dout are multiples of 128 (lane-dense layouts).
    """
    del b1
    w1 = jnp.asarray(w1)
    w2 = jnp.asarray(w2)
    H, Din = w1.shape
    Dout = w2.shape[0]
    H_pad = _round_up(H, 128)
    Dout_pad = _round_up(Dout, 128)

    w1_t = jnp.zeros((Din, H_pad), compute_dtype).at[:, :H].set(
        w1.T.astype(compute_dtype))
    w2_t = jnp.zeros((H_pad, Dout_pad), compute_dtype).at[:H, :Dout].set(
        w2.T.astype(compute_dtype))
    b2_r = jnp.zeros((1, Dout_pad), jnp.float32).at[:, :Dout].set(
        jnp.asarray(b2, jnp.float32).reshape(1, Dout))
    gamma_p = jnp.zeros((H_pad,), jnp.float32).at[:H].set(
        jnp.asarray(gamma, jnp.float32))
    beta_p = jnp.zeros((H_pad,), jnp.float32).at[:H].set(
        jnp.asarray(beta, jnp.float32))
    return {"w1_t": w1_t, "w2_t": w2_t, "b2_r": b2_r,
            "gamma_p": gamma_p, "beta_p": beta_p,
            "din": Din, "h_pad": H_pad, "dout": Dout, "dout_pad": Dout_pad}


def _choose_tile_b(B, din, h_pad, dout_pad, x_itemsize, budget_bytes,
                   stash_h):
    wb = 2  # bf16 weight bytes
    # Resident (constant index_map) blocks are double-buffered by Pallas ->
    # count them at 2x so we don't overshoot the VMEM limit.
    weight_bytes = 2 * wb * (din * h_pad + h_pad * dout_pad) \
        + 2 * 4 * 8 * (h_pad + dout_pad)
    # Streaming per-row footprint: double-buffered x / out tiles plus the f32
    # h intermediate; the bf16 h slab (in & out) when it is materialized.
    bytes_per_row = 2 * x_itemsize * (din + dout_pad) + 4 * h_pad
    if stash_h:
        bytes_per_row += 2 * 2 * 2 * h_pad
    avail = max(budget_bytes - weight_bytes, 0)
    sub = max(8, 32 // max(x_itemsize, 1))      # sublane multiple per dtype
    tb = int(min(1024, max(sub, avail // max(bytes_per_row, 1))))
    if tb >= 256 and B >= 256:
        tb = _round_down(tb, 256)               # MXU-friendly M on v6e/v7x
    elif tb >= 128 and B >= 128:
        tb = _round_down(tb, 128)               # v5e MXU tile
    tb = min(tb, _round_up(B, sub))
    return max(sub, _round_down(tb, sub))


# ---------------------------------------------------------------------------
# Forward pass
# ---------------------------------------------------------------------------
def batch_norm_head_apply(x, params, *, tile_b=None, stash_h=None):
    x = jnp.asarray(x)
    B, Din = x.shape
    assert Din == params["din"]
    w1_t, w2_t, b2_r = params["w1_t"], params["w2_t"], params["b2_r"]
    gamma_p, beta_p = params["gamma_p"], params["beta_p"]
    H_pad, Dout_pad, Dout = params["h_pad"], params["dout_pad"], params["dout"]

    vmem_limit, tile_budget = _vmem_budgets()
    if stash_h is None:
        # Materialize bf16 h between passes only when recomputing x @ W1 would
        # cost more than streaming h once (large Din).
        stash_h = Din > 2 * H_pad

    sub = max(8, 32 // x.dtype.itemsize)
    if tile_b is None:
        tile_b = _choose_tile_b(B, Din, H_pad, Dout_pad, x.dtype.itemsize,
                                tile_budget, stash_h)
    else:
        tile_b = max(sub, _round_down(int(tile_b), sub))
    tile_b = min(tile_b, _round_up(B, sub))

    nb = _cdiv(B, tile_b)
    n_split = 2 if nb >= 2 else 1        # pass-1 core split (v7x megacore)
    nb_inner = _cdiv(nb, n_split)
    B_pad = n_split * nb_inner * tile_b
    if B_pad != B:
        x = jnp.zeros((B_pad, Din), x.dtype).at[:B].set(x)
    nb2 = B_pad // tile_b

    resident2 = lambda c, i: (0, 0)
    x_tiles2 = lambda c, i: (c * nb_inner + i, 0)
    stats_part = lambda c, i: (c, 0, 0)

    # ---- Pass 1: per-core partial batch stats ------------------------------
    stats_out_shapes = [jax.ShapeDtypeStruct((n_split, 8, H_pad), jnp.float32),
                        jax.ShapeDtypeStruct((n_split, 8, H_pad), jnp.float32)]
    stats_out_specs = [pl.BlockSpec((1, 8, H_pad), stats_part),
                       pl.BlockSpec((1, 8, H_pad), stats_part)]
    if stash_h:
        stats_out_shapes = ([jax.ShapeDtypeStruct((B_pad, H_pad), jnp.bfloat16)]
                            + stats_out_shapes)
        stats_out_specs = ([pl.BlockSpec((tile_b, H_pad), x_tiles2)]
                           + stats_out_specs)

    stats_kernel = functools.partial(_stats_kernel, n_valid=B, tile_b=tile_b,
                                     nb_inner=nb_inner, stash_h=stash_h)
    stats_out = pl.pallas_call(
        stats_kernel,
        out_shape=tuple(stats_out_shapes),
        grid_spec=pltpu.PrefetchScalarGridSpec(
            num_scalar_prefetch=0,
            grid=(n_split, nb_inner),
            in_specs=[pl.BlockSpec((tile_b, Din), x_tiles2),
                      pl.BlockSpec((Din, H_pad), resident2)],
            out_specs=tuple(stats_out_specs),
            scratch_shapes=[pltpu.VMEM((1, H_pad), jnp.float32),
                            pltpu.VMEM((1, H_pad), jnp.float32)]),
        compiler_params=pltpu.CompilerParams(
            dimension_semantics=("parallel", "arbitrary"),
            vmem_limit_bytes=vmem_limit),
        cost_estimate=pl.CostEstimate(
            flops=2 * B_pad * Din * H_pad + 4 * B_pad * H_pad,
            transcendentals=0,
            bytes_accessed=x.dtype.itemsize * B_pad * Din
            + 2 * Din * H_pad + 4 * n_split * 16 * H_pad
            + (2 * B_pad * H_pad if stash_h else 0)),
    )(x, w1_t)
    if stash_h:
        h_mat, psum, psumsq = stats_out
    else:
        psum, psumsq = stats_out

    # ---- Tiny finalize in plain JAX: fold BN affine into (scale, shift) ----
    total = psum[:, 0, :].sum(axis=0)            # (H_pad,)
    total_sq = psumsq[:, 0, :].sum(axis=0)
    inv_n = jnp.float32(1.0 / B)
    mean = total * inv_n
    # TODO(synk): E[h^2]-E[h]^2 in f32 can lose precision when |mean| >> std;
    # switch to a centered two-pass variance if that regime matters.
    var = jnp.maximum(total_sq * inv_n - mean * mean, 0.0)   # biased (train)
    inv_std = jax.lax.rsqrt(var + BN_EPS)
    scale = (gamma_p * inv_std).reshape(1, H_pad).astype(jnp.float32)
    shift = (beta_p - mean * gamma_p * inv_std).reshape(1, H_pad).astype(
        jnp.float32)

    # ---- Pass 2: normalize + ReLU + Linear 2 --------------------------------
    rows = lambda i: (i, 0)
    const = lambda i: (0, 0)
    compiler_params = pltpu.CompilerParams(
        dimension_semantics=("parallel",),        # megacore-shardable on v7x
        vmem_limit_bytes=vmem_limit)
    out_shape = jax.ShapeDtypeStruct((B_pad, Dout_pad), x.dtype)

    if stash_h:
        out_pad = pl.pallas_call(
            _apply_from_h_kernel,
            out_shape=out_shape,
            grid_spec=pltpu.PrefetchScalarGridSpec(
                num_scalar_prefetch=0,
                grid=(nb2,),
                in_specs=[pl.BlockSpec((tile_b, H_pad), rows),
                          pl.BlockSpec((1, H_pad), const),
                          pl.BlockSpec((1, H_pad), const),
                          pl.BlockSpec((H_pad, Dout_pad), const),
                          pl.BlockSpec((1, Dout_pad), const)],
                out_specs=pl.BlockSpec((tile_b, Dout_pad), rows)),
            compiler_params=compiler_params,
            cost_estimate=pl.CostEstimate(
                flops=2 * B_pad * H_pad * Dout_pad + 3 * B_pad * H_pad,
                transcendentals=0,
                bytes_accessed=2 * B_pad * H_pad + 2 * H_pad * Dout_pad
                + x.dtype.itemsize * B_pad * Dout_pad),
        )(h_mat, scale, shift, w2_t, b2_r)
    else:
        out_pad = pl.pallas_call(
            _apply_from_x_kernel,
            out_shape=out_shape,
            grid_spec=pltpu.PrefetchScalarGridSpec(
                num_scalar_prefetch=0,
                grid=(nb2,),
                in_specs=[pl.BlockSpec((tile_b, Din), rows),
                          pl.BlockSpec((Din, H_pad), const),
                          pl.BlockSpec((1, H_pad), const),
                          pl.BlockSpec((1, H_pad), const),
                          pl.BlockSpec((H_pad, Dout_pad), const),
                          pl.BlockSpec((1, Dout_pad), const)],
                out_specs=pl.BlockSpec((tile_b, Dout_pad), rows)),
            compiler_params=compiler_params,
            cost_estimate=pl.CostEstimate(
                flops=2 * B_pad * H_pad * (Din + Dout_pad) + 3 * B_pad * H_pad,
                transcendentals=0,
                bytes_accessed=x.dtype.itemsize * B_pad * (Din + Dout_pad)
                + 2 * Din * H_pad + 2 * H_pad * Dout_pad),
        )(x, w1_t, scale, shift, w2_t, b2_r)

    if B_pad == B and Dout_pad == Dout:
        return out_pad                       # avoid an extra HBM copy
    return out_pad[:B, :Dout]


def batch_norm_head(x, w1, b1, gamma, beta, w2, b2):
    """One-shot convenience wrapper (param prep + forward)."""
    return batch_norm_head_apply(x, prepare_params(w1, b1, gamma, beta, w2, b2))


# ---------------------------------------------------------------------------
# Reference + demo
# ---------------------------------------------------------------------------
def _reference(x, w1, b1, gamma, beta, w2, b2):
    h = x.astype(jnp.float32) @ w1.T + b1
    mean = jnp.mean(h, axis=0, keepdims=True)
    var = jnp.mean((h - mean) ** 2, axis=0, keepdims=True)
    h = (h - mean) / jnp.sqrt(var + BN_EPS) * gamma + beta
    h = jnp.maximum(h, 0.0)
    return h @ w2.T + b2


if __name__ == "__main__":
    B, SIZE_IN, SIZE_HID, SIZE_OUT = 8, 32, 64, 16

    key = jax.random.PRNGKey(0)
    kx, k1, k2, k3, k4, k5, k6 = jax.random.split(key, 7)

    x = jax.random.normal(kx, (B, SIZE_IN), dtype=jnp.float32)

    # PyTorch Linear layout: (out_features, in_features).
    w1 = jax.random.normal(k1, (SIZE_HID, SIZE_IN), dtype=jnp.float32) * 0.1
    b1 = jax.random.normal(k2, (SIZE_HID,), dtype=jnp.float32) * 0.1
    w2 = jax.random.normal(k3, (SIZE_OUT, SIZE_HID), dtype=jnp.float32) * 0.1
    b2 = jax.random.normal(k4, (SIZE_OUT,), dtype=jnp.float32) * 0.1
    gamma = 1.0 + 0.1 * jax.random.normal(k5, (SIZE_HID,), dtype=jnp.float32)
    beta = 0.1 * jax.random.normal(k6, (SIZE_HID,), dtype=jnp.float32)

    # One-time parameter prep (hoisted out of the per-call hot path).
    params = prepare_params(w1, b1, gamma, beta, w2, b2)

    out = batch_norm_head_apply(x, params)
    out = jax.block_until_ready(out)

    ref = _reference(x, w1, b1, gamma, beta, w2, b2)
    assert out.shape == (B, SIZE_OUT), out.shape
    # bf16 MXU operands (f32 accumulation) -> compare with bf16-level tolerance.
    assert jnp.allclose(out, ref, atol=5e-2, rtol=5e-2), \
        float(jnp.max(jnp.abs(out - ref)))

    print("KERNEL_OK")
</pallas_src>

<mosaic_0001>
module attributes {stable_mosaic.version = 11 : i64} {
  func.func @_stats_kernel(%arg0: i32, %arg1: i32, %arg2: memref<8x32xf32, #tpu.memory_space<vmem>>, %arg3: memref<32x128xbf16, #tpu.memory_space<vmem>>, %arg4: memref<1x8x128xf32, #tpu.memory_space<vmem>>, %arg5: memref<1x8x128xf32, #tpu.memory_space<vmem>>, %arg6: memref<1x128xf32, #tpu.memory_space<vmem>>, %arg7: memref<1x128xf32, #tpu.memory_space<vmem>>) attributes {dimension_semantics = [#tpu.dimension_semantics<parallel>, #tpu.dimension_semantics<arbitrary>], iteration_bounds = array<i64: 1, 1>, scalar_prefetch = 0 : i64, scratch_operands = 2 : i64, tpu.core_type = #tpu.core_type<tc>, window_params = [{transform_indices = @transform_0, window_bounds = array<i64: 8, 32>}, {pipeline_mode = #tpu.pipeline_mode<synchronous>, transform_indices = @transform_1, window_bounds = array<i64: 32, 128>}, {transform_indices = @transform_2, window_bounds = array<i64: 1, 8, 128>}, {transform_indices = @transform_3, window_bounds = array<i64: 1, 8, 128>}]} {
    %c0_i32 = arith.constant 0 : i32
    %0 = arith.cmpi eq, %arg1, %c0_i32 : i32
    %1 = arith.extui %0 : i1 to i32
    %c0_i32_0 = arith.constant 0 : i32
    %2 = arith.cmpi ne, %1, %c0_i32_0 : i32
    scf.if %2 {
      %cst_17 = arith.constant 0.000000e+00 : f32
      %29 = vector.broadcast %cst_17 : f32 to vector<1x128xf32>
      %c0_18 = arith.constant 0 : index
      %c0_19 = arith.constant 0 : index
      %30 = vector.load %arg6[%c0_18, %c0_19] : memref<1x128xf32, #tpu.memory_space<vmem>>, vector<1x128xf32>
      tpu.vector_store %arg6[%c0_18, %c0_19], %29 {strides = array<i32>} : memref<1x128xf32, #tpu.memory_space<vmem>>, vector<1x128xf32>,
      %cst_20 = arith.constant 0.000000e+00 : f32
      %31 = vector.broadcast %cst_20 : f32 to vector<1x128xf32>
      %c0_21 = arith.constant 0 : index
      %c0_22 = arith.constant 0 : index
      %32 = vector.load %arg7[%c0_21, %c0_22] : memref<1x128xf32, #tpu.memory_space<vmem>>, vector<1x128xf32>
      tpu.vector_store %arg7[%c0_21, %c0_22], %31 {strides = array<i32>} : memref<1x128xf32, #tpu.memory_space<vmem>>, vector<1x128xf32>,
    } else {
    }
    %c0 = arith.constant 0 : index
    %c0_1 = arith.constant 0 : index
    %3 = vector.load %arg2[%c0, %c0_1] : memref<8x32xf32, #tpu.memory_space<vmem>>, vector<8x32xf32>
    %4 = arith.truncf %3 : vector<8x32xf32> to vector<8x32xbf16>
    %c0_2 = arith.constant 0 : index
    %c0_3 = arith.constant 0 : index
    %5 = vector.load %arg3[%c0_2, %c0_3] : memref<32x128xbf16, #tpu.memory_space<vmem>>, vector<32x128xbf16>
    %cst = arith.constant dense<0.000000e+00> : vector<8x128xf32>
    %6 = tpu.matmul %4, %5, %cst {dimension_numbers = #tpu.dot_dimension_numbers<[1], [0], [0], [1], [0, 0, 1, 1], [], []>} : vector<8x32xbf16>, vector<32x128xbf16>, vector<8x128xf32> -> vector<8x128xf32>
    %c1_i32 = arith.constant 1 : i32
    %7 = arith.muli %arg0, %c1_i32 : i32
    %8 = arith.addi %7, %arg1 : i32
    %c8_i32 = arith.constant 8 : i32
    %9 = arith.muli %8, %c8_i32 : i32
    %10 = tpu.iota {dimensions = array<i32: 1>} : vector<1x8xi32>
    %11 = vector.broadcast %9 : i32 to vector<1x8xi32>
    %12 = arith.addi %11, %10 : vector<1x8xi32>
    %c8_i32_4 = arith.constant 8 : i32
    %13 = vector.broadcast %c8_i32_4 : i32 to vector<1x8xi32>
    %14 = arith.cmpi slt, %12, %13 : vector<1x8xi32>
    %15 = arith.extui %14 : vector<1x8xi1> to vector<1x8xi32>
    %16 = arith.sitofp %15 : vector<1x8xi32> to vector<1x8xf32>
    %c0_5 = arith.constant 0 : index
    %c0_6 = arith.constant 0 : index
    %17 = vector.load %arg6[%c0_5, %c0_6] : memref<1x128xf32, #tpu.memory_space<vmem>>, vector<1x128xf32>
    %cst_7 = arith.constant dense<0.000000e+00> : vector<1x128xf32>
    %18 = tpu.matmul %16, %6, %cst_7 {dimension_numbers = #tpu.dot_dimension_numbers<[1], [0], [0], [1], [0, 0, 1, 1], [], []>} : vector<1x8xf32>, vector<8x128xf32>, vector<1x128xf32> -> vector<1x128xf32>
    %19 = arith.addf %17, %18 : vector<1x128xf32>
    %c0_8 = arith.constant 0 : index
    %c0_9 = arith.constant 0 : index
    %20 = vector.load %arg6[%c0_8, %c0_9] : memref<1x128xf32, #tpu.memory_space<vmem>>, vector<1x128xf32>
    tpu.vector_store %arg6[%c0_8, %c0_9], %19 {strides = array<i32>} : memref<1x128xf32, #tpu.memory_space<vmem>>, vector<1x128xf32>,
    %c0_10 = arith.constant 0 : index
    %c0_11 = arith.constant 0 : index
    %21 = vector.load %arg7[%c0_10, %c0_11] : memref<1x128xf32, #tpu.memory_space<vmem>>, vector<1x128xf32>
    %22 = arith.mulf %6, %6 : vector<8x128xf32>
    %cst_12 = arith.constant dense<0.000000e+00> : vector<1x128xf32>
    %23 = tpu.matmul %16, %22, %cst_12 {dimension_numbers = #tpu.dot_dimension_numbers<[1], [0], [0], [1], [0, 0, 1, 1], [], []>} : vector<1x8xf32>, vector<8x128xf32>, vector<1x128xf32> -> vector<1x128xf32>
    %24 = arith.addf %21, %23 : vector<1x128xf32>
    %c0_13 = arith.constant 0 : index
    %c0_14 = arith.constant 0 : index
    %25 = vector.load %arg7[%c0_13, %c0_14] : memref<1x128xf32, #tpu.memory_space<vmem>>, vector<1x128xf32>
    tpu.vector_store %arg7[%c0_13, %c0_14], %24 {strides = array<i32>} : memref<1x128xf32, #tpu.memory_space<vmem>>, vector<1x128xf32>,
    %c0_i32_15 = arith.constant 0 : i32
    %26 = arith.cmpi eq, %arg1, %c0_i32_15 : i32
    %27 = arith.extui %26 : i1 to i32
    %c0_i32_16 = arith.constant 0 : i32
    %28 = arith.cmpi ne, %27, %c0_i32_16 : i32
    scf.if %28 {
      %c0_17 = arith.constant 0 : index
      %c0_18 = arith.constant 0 : index
      %29 = vector.load %arg6[%c0_17, %c0_18] : memref<1x128xf32, #tpu.memory_space<vmem>>, vector<1x128xf32>
      %30 = vector.shape_cast %29 : vector<1x128xf32> to vector<1x1x128xf32>
      %31 = vector.shape_cast %30 : vector<1x1x128xf32> to vector<1x1x128xf32>
      %32 = vector.broadcast %31 : vector<1x1x128xf32> to vector<1x8x128xf32>
      %c0_19 = arith.constant 0 : index
      %c0_20 = arith.constant 0 : index
      %c0_21 = arith.constant 0 : index
      %33 = vector.load %arg4[%c0_19, %c0_20, %c0_21] : memref<1x8x128xf32, #tpu.memory_space<vmem>>, vector<1x8x128xf32>
      tpu.vector_store %arg4[%c0_19, %c0_20, %c0_21], %32 {strides = array<i32>} : memref<1x8x128xf32, #tpu.memory_space<vmem>>, vector<1x8x128xf32>,
      %c0_22 = arith.constant 0 : index
      %c0_23 = arith.constant 0 : index
      %34 = vector.load %arg7[%c0_22, %c0_23] : memref<1x128xf32, #tpu.memory_space<vmem>>, vector<1x128xf32>
      %35 = vector.shape_cast %34 : vector<1x128xf32> to vector<1x1x128xf32>
      %36 = vector.shape_cast %35 : vector<1x1x128xf32> to vector<1x1x128xf32>
      %37 = vector.broadcast %36 : vector<1x1x128xf32> to vector<1x8x128xf32>
      %c0_24 = arith.constant 0 : index
      %c0_25 = arith.constant 0 : index
      %c0_26 = arith.constant 0 : index
      %38 = vector.load %arg5[%c0_24, %c0_25, %c0_26] : memref<1x8x128xf32, #tpu.memory_space<vmem>>, vector<1x8x128xf32>
      tpu.vector_store %arg5[%c0_24, %c0_25, %c0_26], %37 {strides = array<i32>} : memref<1x8x128xf32, #tpu.memory_space<vmem>>, vector<1x8x128xf32>,
    } else {
    }
    return
  }
  func.func @transform_0(%arg0: i32, %arg1: i32) -> (i32, i32) {
    %c1_i32 = arith.constant 1 : i32
    %0 = arith.muli %arg0, %c1_i32 : i32
    %1 = arith.addi %0, %arg1 : i32
    %c0_i32 = arith.constant 0 : i32
    %c0_i32_0 = arith.constant 0 : i32
    return %1, %c0_i32 : i32, i32
  }
  func.func @transform_1(%arg0: i32, %arg1: i32) -> (i32, i32) {
    %c0_i32 = arith.constant 0 : i32
    %c0_i32_0 = arith.constant 0 : i32
    %c0_i32_1 = arith.constant 0 : i32
    return %c0_i32, %c0_i32_0 : i32, i32
  }
  func.func @transform_2(%arg0: i32, %arg1: i32) -> (i32, i32, i32) {
    %c0_i32 = arith.constant 0 : i32
    %c0_i32_0 = arith.constant 0 : i32
    %c0_i32_1 = arith.constant 0 : i32
    return %arg0, %c0_i32, %c0_i32_0 : i32, i32, i32
  }
  func.func @transform_3(%arg0: i32, %arg1: i32) -> (i32, i32, i32) {
    %c0_i32 = arith.constant 0 : i32
    %c0_i32_0 = arith.constant 0 : i32
    %c0_i32_1 = arith.constant 0 : i32
    return %arg0, %c0_i32, %c0_i32_0 : i32, i32, i32
  }
}

</mosaic_0001>

<bundles_post_ra>
// kernel: tpu_custom_call.1
= control target key start
LH: loop header
LB: loop body
LE: loop exit
PB: predicated region body
PF: predicated region fallthrough
CT: control target
= control target key end

     0   :  { %9 = vsyncpa [#allocation5], 0  ;;  %s497_s0 = inlined_call_operand.hbm [shape: f32[8,32], index: 0, kind: input, shape index: {}]   ;;  %s498_s1 = inlined_call_operand.hbm [shape: bf16[32,128], index: 1, kind: input, shape index: {}]   ;;  %s499_s2 = inlined_call_operand.hbm [shape: f32[1,8,128], index: 2, kind: output, shape index: {0}]   ;;  %s500_s3 = inlined_call_operand.hbm [shape: f32[1,8,128], index: 3, kind: output, shape index: {1}]  }
   0x1   :  { %10 = vsyncpa [#allocation8], 0 }
   0x2   :  { %11 = vsyncpa [#allocation6], 0 }
   0x3   :  { %12 = vsyncpa [#allocation11], 0  ;;  %s454_s12 = smov [#allocation4]   ;;  %s455_s14 = smov [#allocation7]  }
   0x4   :  { %s22_s13 = sshll.u32 %s454_s12, 4  ;;  %s31_s15 = sshll.u32 %s455_s14, 4  ;;  %s23_s13 = int_to_ptr.vmem [resolvable:$true] %s22_s13  ;;  %s32_s15 = int_to_ptr.vmem [resolvable:$true] %s31_s15 }
   0x5   :  { %s374_s16 = scalar_lea.vmem %s23_s13, 128  ;;  %p379_p1 = scmp.lt.s32.totalorder %s23_s13, %s23_s13 }
   0x6   :  { %p375_p0 = scmp.ne.s32.totalorder %s23_s13, %s374_s16  ;;  %p380_p2 = scmp.lt.s32.totalorder %s374_s16, %s374_s16 }
   0x8   :  { %p381_p3 = por %p380_p2, %p379_p1 }
   0xa   :  { %p382_p4 = pnand %p381_p3, %p375_p0 }
   0xc   :  { %385 = shalt.err (!%p382_p4)
}
   0xd   :  { %25 = dma.hbm_to_vmem [thread:$0]  %s497_s0, 128, %s23_s13, [#allocation5]  }
   0xe   :  { %s394_s19 = scalar_lea.vmem %s32_s15, 256  ;;  %p399_p6 = scmp.lt.s32.totalorder %s32_s15, %s32_s15 }
   0xf   :  { %p395_p5 = scmp.ne.s32.totalorder %s32_s15, %s394_s19  ;;  %p400_p7 = scmp.lt.s32.totalorder %s394_s19, %s394_s19 }
  0x11   :  { %p401_p8 = por %p400_p7, %p399_p6 }
  0x13   :  { %p402_p9 = pnand %p401_p8, %p395_p5 }
  0x15   :  { %405 = shalt.err (!%p402_p9)
}
  0x16   :  { %s456_s20 = smov 64   ;;  %s457_s21 = smov 4  }
  0x17   :  { %37 = dma.hbm_to_vmem [thread:$0]  %s498_s1, 256, %s32_s15, [#allocation8], %s456_s20, %s456_s20, %s457_s21  }
  0x18   :  { %446 = dma.done.wait [#allocation5], 128  }
  0x19   :  { %447 = vsyncadd [#allocation5], 4294967168 }
  0x1a   :  { %448 = dma.done.wait [#allocation8], 256  }
  0x1b   :  { %449 = vsyncadd [#allocation8], 4294967040  ;;  %v458_v0 = vmov 0.0   ;;  %vm459_vm0 = vmmov 0   ;;  %v364_v1 = vld [vmem:[#allocation7 + $0x8] sm:$0xff]   ;;  %v365_v2 = vld [vmem:[#allocation7] sm:$0xff]   ;;  %v116_v5 = vlaneseq }
  0x1c   :  { %338 = vmatprep.subr.bf16.mxu0 %v458_v0  ;;  %50 = vst [vmem:[#allocation2] sm:$0x1] %v458_v0  ;;  %51 = vst [vmem:[#allocation3] sm:$0x1] %v458_v0  ;;  %342 = vmatprep.mubr.msk.bf16.mxu0 %vm459_vm0, %v458_v0  ;;  %v52_v3 = vld [vmem:[#allocation4] sm:$0xff]  ;;  %vm70_vm1 = vcmask 261120  }
  0x1d   :  { %346 = vmatprep.subr.mxu1 %v458_v0  ;;  %348 = vmatprep.mubr.msk.f32.mxu1 %vm459_vm0, %v458_v0  ;;  %v53_v4 = vpack.c.bf16 %v52_v3, %v52_v3  ;;  %v117_v6 = vand.u32 127, %v116_v5  ;;  %vm124_vm3 = vcmask 64512   ;;  %s460_s0 = smov [#allocation9]   ;;  %s461_s24 = smov [#allocation10]  }
  0x1e   :  { %339 = vmatpush3.bf16.msra.mxu0 %v364_v1  ;;  %s299_s1 = sshll.u32 %s460_s0, 4  ;;  %s309_s25 = sshll.u32 %s461_s24, 4  ;;  %s300_s1 = int_to_ptr.vmem [resolvable:$true] %s299_s1  ;;  %s310_s25 = int_to_ptr.vmem [resolvable:$true] %s309_s25 }
  0x1f   :  { %340 = vmatprep.subr.bf16.mxu0 %v458_v0  ;;  %vm120_vm2 = vcmp.lt.s32.totalorder %v117_v6, 8  ;;  %s406_s26 = scalar_lea.vmem %s300_s1, 128  ;;  %p411_p11 = scmp.lt.s32.totalorder %s300_s1, %s300_s1 }
  0x20   :  { %v326_v7 = vsel %vm120_vm2, 1.0, %v458_v0  ;;  %p407_p10 = scmp.ne.s32.totalorder %s300_s1, %s406_s26  ;;  %p412_p12 = scmp.lt.s32.totalorder %s406_s26, %s406_s26 }
  0x22   :  { %341 = vmatpush3.bf16.msra.mxu0 %v365_v2  ;;  %p413_p13 = por %p412_p12, %p411_p11 }
  0x23   :  { %v123_v13 = vld [vmem:[#allocation2] sm:$0x1]  ;;  %v200_v17 = vld [vmem:[#allocation3] sm:$0x1] }
  0x24   :  { %p414_p0 = pnand %p413_p13, %p407_p10 }
  0x25   :  { %343 = vmatmul.mubr.msk.bf16.vlgmr.msra.gmra.mxu0 %vm70_vm1, %v53_v4 }
  0xe5   :  { %v108_v8 = vpop.f32.mrf.mxu0 }
  0xe6   :  { %v201_v9 = vmul.f32 %v108_v8, %v108_v8  ;;  %347 = vmatpush3.msra.mxu1 %v108_v8 }
  0xe7   :  { %v344_v10 = vpop.f32.mrf.mxu0  ;;  %349 = vmatmul.mubr.msk.f32.vlgmr.msra.gmra.mxu1 %vm124_vm3, %v326_v7  ;;  %351 = vmatprep.subr.mxu1 %v458_v0 }
  0xe8   :  { %352 = vmatpush3.msra.mxu1 %v201_v9  ;;  %353 = vmatprep.mubr.msk.f32.mxu1 %vm459_vm0, %v458_v0 }
  0xe9   :  { %v111_v11 = vpop.f32.mrf.mxu0 }
  0xeb   :  { %v345_v12 = vpop.f32.mrf.mxu0  ;;  %354 = vmatmul.mubr.msk.f32.vlgmr.msra.gmra.mxu1 %vm124_vm3, %v326_v7 }
 0x1a7   :  { %v194_v14 = vpop.f32.mrf.mxu1 }
 0x1a8   :  { %v198_v15 = vadd.f32 %v194_v14, %v123_v13 }
 0x1a9   :  { %v350_v16 = vpop.f32.mrf.mxu1 }
 0x1aa   :  { %199 = vst [vmem:[#allocation2] sm:$0x1] %v198_v15 }
 0x1ab   :  { %v268_v18 = vpop.f32.mrf.mxu1 }
 0x1ac   :  { %v272_v19 = vadd.f32 %v268_v18, %v200_v17 }
 0x1ad   :  { %v355_v20 = vpop.f32.mrf.mxu1 }
 0x1ae   :  { %273 = vst [vmem:[#allocation3] sm:$0x1] %v272_v19 }
 0x1b1   :  { %v329_v21 = vld [vmem:[#allocation2] ss:$0 sm:$0xff] }
 0x1b2   :  { %284 = vst [vmem:[#allocation9] sm:$0xff] %v329_v21 }
 0x1b3   :  { %417 = shalt.err (!%p414_p0)
}
 0x1b4   :  { %302 = dma.vmem_to_hbm [thread:$0]  %s300_s1, 128, %s499_s2, [#allocation6]  }
 0x1b5   :  { %v330_v22 = vld [vmem:[#allocation3] ss:$0 sm:$0xff]  ;;  %s426_s29 = scalar_lea.vmem %s310_s25, 128  ;;  %p431_p2 = scmp.lt.s32.totalorder %s310_s25, %s310_s25 }
 0x1b6   :  { %292 = vst [vmem:[#allocation10] sm:$0xff] %v330_v22  ;;  %p427_p1 = scmp.ne.s32.totalorder %s310_s25, %s426_s29  ;;  %p432_p3 = scmp.lt.s32.totalorder %s426_s29, %s426_s29 }
 0x1b8   :  { %p433_p4 = por %p432_p3, %p431_p2 }
 0x1ba   :  { %p434_p5 = pnand %p433_p4, %p427_p1 }
 0x1bc   :  { %437 = shalt.err (!%p434_p5)
}
 0x1bd   :  { %312 = dma.vmem_to_hbm [thread:$0]  %s310_s25, 128, %s500_s3, [#allocation11]  }
 0x1be   :  { %450 = dma.done.wait [#allocation6], 128  }
 0x1bf   :  { %451 = vsyncadd [#allocation6], 4294967168 }
 0x1c0   :  { %452 = dma.done.wait [#allocation11], 128  }
 0x1c1   :  { %453 = vsyncadd [#allocation11], 4294967168 }
 0x1c2   :  { %319 = vsyncpa [#allocation5], 1 }
 0x1c3   :  { %320 = vsyncpa [#allocation8], 1 }
 0x1c4   :  { %321 = vsyncpa [#allocation6], 1 }
 0x1c5   :  { %322 = vsyncpa [#allocation11], 1 }

</bundles_post_ra>
